<compile_context>
chip_gen: v7x
topology: tpu7x:2x2x1
jax: 0.10.0
libtpu: 0.0.40
codegen_flags: <defaults>
</compile_context>

<pallas_src>
import jax
import jax.numpy as jnp
from jax.experimental import pallas as pl
from jax.experimental.pallas import tpu as pltpu

_LANE_CANDIDATES = (512, 256, 128)   # lane-dense last dims (multiples of 128)
_MIN_LANE = 128
_TARGET_BLOCK_BYTES = 8 << 20        # ~8 MiB moved per grid step (any dtype)
_MIN_PALLAS_BYTES = 1 << 20          # below this, let XLA fuse the multiply


def _scale_kernel(scale_ref, x_ref, o_ref):
    # scale_ref: SMEM (1,) scalar; x_ref/o_ref: (tile_rows, lane) VMEM tiles.
    o_ref[...] = (x_ref[...] * scale_ref[0]).astype(o_ref.dtype)


def scale_layer(x: jax.Array, scale: jax.Array, *,
                min_pallas_bytes: int = _MIN_PALLAS_BYTES) -> jax.Array:
    """out = x * scale (scale is a 1-element f32 parameter, like nn.Parameter).

    Output dtype matches x.dtype (the module is float-only in practice).
    """
    orig_shape = x.shape
    total = x.size
    itemsize = jnp.dtype(x.dtype).itemsize

    if total == 0:
        return x

    # Tiny-tensor escape hatch: pallas_call launch + pipeline prologue would
    # dominate; a plain multiply fuses into the neighboring conv for free.
    if total * itemsize < min_pallas_bytes:
        return (x * scale[0]).astype(x.dtype)

    # Pick a lane width that divides the element count -> zero-copy reshape.
    lane = None
    for cand in _LANE_CANDIDATES:
        if total % cand == 0:
            lane = cand
            break

    flat = x.reshape(-1)
    if lane is None:
        # Ragged total: pad only to the next multiple of 128 (rare path).
        lane = _MIN_LANE
        padded_total = pl.cdiv(total, lane) * lane
        flat = jnp.pad(flat, (0, padded_total - total))
    else:
        padded_total = total

    rows = padded_total // lane
    x2 = flat.reshape(rows, lane)

    # Byte-based tile sizing: same bytes per grid step regardless of dtype.
    tile_rows = max(8, (_TARGET_BLOCK_BYTES // (lane * itemsize)) // 8 * 8)
    tile_rows = min(rows, tile_rows)          # if < 8: block == full array dims
    grid = (pl.cdiv(rows, tile_rows),)        # trailing partial block is masked

    block_bytes = tile_rows * lane * itemsize
    # 2x double-buffered input + 2x double-buffered output, plus headroom.
    vmem_limit = max(32 << 20, 4 * block_bytes + (4 << 20))

    out2 = pl.pallas_call(
        _scale_kernel,
        out_shape=jax.ShapeDtypeStruct((rows, lane), x.dtype),
        grid=grid,
        in_specs=[
            pl.BlockSpec(memory_space=pltpu.SMEM),               # scalar param
            pl.BlockSpec((tile_rows, lane), lambda i: (i, 0)),   # lane-dense slab
        ],
        out_specs=pl.BlockSpec((tile_rows, lane), lambda i: (i, 0)),
        compiler_params=pltpu.CompilerParams(
            dimension_semantics=("parallel",),
            vmem_limit_bytes=vmem_limit,
        ),
    )(scale, x2)

    out_flat = out2.reshape(-1)
    if padded_total != total:
        out_flat = out_flat[:total]
    return out_flat.reshape(orig_shape)


if __name__ == "__main__":
    key = jax.random.PRNGKey(0)
    # Small NCHW input, consistent with the module's usage in a conv U-Net.
    x = jax.random.normal(key, (2, 4, 16, 16), dtype=jnp.float32)

    # Deterministic parameter init, matching nn.Parameter(torch.FloatTensor([0.001]))
    init_value = 0.001
    scale = jnp.array([init_value], dtype=jnp.float32)

    ref = x * scale[0]

    # 1) Default path: tiny tensor -> fused-multiply escape hatch.
    out_small = scale_layer(x, scale)
    jax.block_until_ready(out_small)
    assert out_small.shape == x.shape and out_small.dtype == x.dtype
    assert jnp.allclose(out_small, ref, atol=1e-6, rtol=1e-6)

    # 2) Force the Pallas kernel path (lane-aligned, no padding copy).
    out_pallas = scale_layer(x, scale, min_pallas_bytes=0)
    jax.block_until_ready(out_pallas)
    assert out_pallas.shape == x.shape and out_pallas.dtype == x.dtype
    assert jnp.allclose(out_pallas, ref, atol=1e-6, rtol=1e-6)

    # 3) Ragged element count -> exercises the pad-to-128 branch through Pallas.
    _, k1 = jax.random.split(key)
    y = jax.random.normal(k1, (3, 5, 7), dtype=jnp.float32)
    out_ragged = scale_layer(y, scale, min_pallas_bytes=0)
    jax.block_until_ready(out_ragged)
    assert out_ragged.shape == y.shape and out_ragged.dtype == y.dtype
    assert jnp.allclose(out_ragged, y * scale[0], atol=1e-6, rtol=1e-6)

    print("KERNEL_OK")
</pallas_src>

<mosaic_0001>
module attributes {stable_mosaic.version = 11 : i64} {
  func.func @_scale_kernel(%arg0: i32, %arg1: memref<1xf32, #tpu.memory_space<smem>>, %arg2: memref<4x512xf32, #tpu.memory_space<vmem>>, %arg3: memref<4x512xf32, #tpu.memory_space<vmem>>) attributes {dimension_semantics = [#tpu.dimension_semantics<parallel>], iteration_bounds = array<i64: 1>, scalar_prefetch = 0 : i64, scratch_operands = 0 : i64, tpu.core_type = #tpu.core_type<tc>, window_params = [{transform_indices = @transform_0, window_bounds = array<i64: 1>}, {transform_indices = @transform_1, window_bounds = array<i64: 4, 512>}, {transform_indices = @transform_2, window_bounds = array<i64: 4, 512>}]} {
    %c0 = arith.constant 0 : index
    %c0_0 = arith.constant 0 : index
    %0 = vector.load %arg2[%c0, %c0_0] : memref<4x512xf32, #tpu.memory_space<vmem>>, vector<4x512xf32>
    %c0_1 = arith.constant 0 : index
    %1 = memref.load %arg1[%c0_1] : memref<1xf32, #tpu.memory_space<smem>>
    %2 = vector.broadcast %1 : f32 to vector<4x512xf32>
    %3 = arith.mulf %0, %2 : vector<4x512xf32>
    %c0_2 = arith.constant 0 : index
    %c0_3 = arith.constant 0 : index
    %4 = vector.load %arg3[%c0_2, %c0_3] : memref<4x512xf32, #tpu.memory_space<vmem>>, vector<4x512xf32>
    tpu.vector_store %arg3[%c0_2, %c0_3], %3 {strides = array<i32>} : memref<4x512xf32, #tpu.memory_space<vmem>>, vector<4x512xf32>,
    return
  }
  func.func @transform_0(%arg0: i32) -> i32 {
    %c0_i32 = arith.constant 0 : i32
    %c0_i32_0 = arith.constant 0 : i32
    return %c0_i32 : i32
  }
  func.func @transform_1(%arg0: i32) -> (i32, i32) {
    %c0_i32 = arith.constant 0 : i32
    %c0_i32_0 = arith.constant 0 : i32
    return %arg0, %c0_i32 : i32, i32
  }
  func.func @transform_2(%arg0: i32) -> (i32, i32) {
    %c0_i32 = arith.constant 0 : i32
    %c0_i32_0 = arith.constant 0 : i32
    return %arg0, %c0_i32 : i32, i32
  }
}

</mosaic_0001>

<bundles_post_ra>
// kernel: tpu_custom_call.1
= control target key start
LH: loop header
LB: loop body
LE: loop exit
PB: predicated region body
PF: predicated region fallthrough
CT: control target
= control target key end

     0   :  { %8 = vsyncpa [#allocation4], 0  ;;  %s142_s0 = inlined_call_operand.<no memory space> [shape: f32[1], index: 0, kind: input, shape index: {}]   ;;  %s143_s1 = inlined_call_operand.hbm [shape: f32[4,512], index: 1, kind: input, shape index: {}]   ;;  %s144_s2 = inlined_call_operand.hbm [shape: f32[4,512], index: 2, kind: output, shape index: {}]  }
   0x1   :  { %9 = vsyncpa [#allocation5], 0  ;;  %s98_s9 = smov [#allocation3]   ;;  %s50_s13 = scalar_lea.hbm %s143_s1, 256 }
   0x2   :  { %s18_s10 = sshll.u32 %s98_s9, 4  ;;  %p51_p0 = scmp.ne.s32.totalorder %s143_s1, %s50_s13  ;;  %s19_s10 = int_to_ptr.vmem [resolvable:$true] %s18_s10 }
   0x3   :  { %p54_p1 = scmp.lt.u32.totalorder %s50_s13, %s143_s1 }
   0x5   :  { %p56_p2 = pnand %p54_p1, %p51_p0 }
   0x7   :  { %59 = shalt.err (!%p56_p2)
}
   0x8   :  { %s60_s18 = scalar_lea.vmem %s19_s10, 256  ;;  %p65_p4 = scmp.lt.s32.totalorder %s19_s10, %s19_s10 }
   0x9   :  { %p61_p3 = scmp.ne.s32.totalorder %s19_s10, %s60_s18  ;;  %p66_p5 = scmp.lt.s32.totalorder %s60_s18, %s60_s18 }
   0xb   :  { %p67_p6 = por %p66_p5, %p65_p4 }
   0xd   :  { %p68_p7 = pnand %p67_p6, %p61_p3 }
   0xf   :  { %71 = shalt.err (!%p68_p7)
}
  0x10   :  { %21 = dma.hbm_to_vmem [thread:$0]  %s143_s1, 256, %s19_s10, [#allocation4]  }
  0x11   :  { %94 = dma.done.wait [#allocation4], 256  }
  0x12   :  { %95 = vsyncadd [#allocation4], 4294967040  ;;  %v28_v0 = vstv %s142_s0  ;;  %s99_s23 = smov [#allocation6]   ;;  %v25_v1 = vld [vmem:[#allocation3] sm:$0xff]  ;;  %v26_v2 = vld [vmem:[#allocation3 + $0x8] sm:$0xff] }
  0x13   :  { %s39_s24 = sshll.u32 %s99_s23, 4  ;;  %v29_v3 = vmul.f32 %v28_v0, %v25_v1  ;;  %v30_v4 = vmul.f32 %v28_v0, %v26_v2  ;;  %s40_s24 = int_to_ptr.vmem [resolvable:$true] %s39_s24 }
  0x14   :  { %s72_s25 = scalar_lea.vmem %s40_s24, 256  ;;  %p77_p9 = scmp.lt.s32.totalorder %s40_s24, %s40_s24 }
  0x15   :  { %31 = vst [vmem:[#allocation6] sm:$0xff] %v29_v3  ;;  %32 = vst [vmem:[#allocation6 + $0x8] sm:$0xff] %v30_v4  ;;  %p73_p8 = scmp.ne.s32.totalorder %s40_s24, %s72_s25  ;;  %p78_p10 = scmp.lt.s32.totalorder %s72_s25, %s72_s25 }
  0x17   :  { %p79_p11 = por %p78_p10, %p77_p9 }
  0x19   :  { %p80_p12 = pnand %p79_p11, %p73_p8 }
  0x1b   :  { %83 = shalt.err (!%p80_p12)
}
  0x1c   :  { %s84_s0 = scalar_lea.hbm %s144_s2, 256 }
  0x1d   :  { %p85_p13 = scmp.ne.s32.totalorder %s144_s2, %s84_s0  ;;  %p88_p0 = scmp.lt.u32.totalorder %s84_s0, %s144_s2 }
  0x1f   :  { %p90_p1 = pnand %p88_p0, %p85_p13 }
  0x21   :  { %93 = shalt.err (!%p90_p1)
}
  0x22   :  { %42 = dma.vmem_to_hbm [thread:$0]  %s40_s24, 256, %s144_s2, [#allocation5]  }
  0x23   :  { %96 = dma.done.wait [#allocation5], 256  }
  0x24   :  { %97 = vsyncadd [#allocation5], 4294967040 }
  0x25   :  { %46 = vsyncpa [#allocation4], 1 }
  0x26   :  { %47 = vsyncpa [#allocation5], 1 }

</bundles_post_ra>
